<compile_context>
chip_gen: v5e
topology: v5e:2x2
jax: 0.10.0
libtpu: 0.0.40
codegen_flags: <defaults>
</compile_context>

<pallas_src>
import functools

import jax
import jax.numpy as jnp
from jax.experimental import pallas as pl
from jax.experimental.pallas import tpu as pltpu


def _round_up(x, m):
    return (x + m - 1) // m * m


def _tpu_vmem_capacity_bytes():
    """Physical per-core VMEM; conservative fallback is v7x's 64 MiB."""
    try:
        cap = getattr(pltpu.get_tpu_info(), "vmem_capacity_bytes", None)
        if cap:
            return int(cap)
    except Exception:
        pass
    return 64 * 1024 * 1024


def _vmem_residency_bytes(tm, H, tn, logits_itemsize):
    """Worst-case pipeline-buffer residency (assumes double buffering everywhere)."""
    x_b = 2 * tm * H * 2                 # bf16 pre-norm activations
    h_b = 2 * tm * H * 2                 # bf16 normalized hidden (output, resident over V)
    w_b = 2 * H * tn * 2                 # bf16 weight tile stream
    o_b = 2 * tm * tn * logits_itemsize  # logits tile
    g_b = 2 * H * 4                      # gamma
    return x_b + h_b + w_b + o_b + g_b


def _pick_vocab_tile(H, V, vmem_cap):
    # 128 MiB parts (v5e/v6e): wide 1024-lane tiles.  64 MiB (v7x): 512 (256 at huge H).
    if vmem_cap >= 96 * 1024 * 1024:
        tn = 1024
    else:
        tn = 512 if H < 8192 else 256
    return min(tn, _round_up(V, 128))


def _pick_token_tile(T, H, tn, vmem_cap, logits_itemsize):
    cap = int(0.6 * vmem_cap)
    t_aligned = _round_up(max(T, 16), 16)  # multiple of 16: bf16 sublane packing
    if t_aligned <= 512 and _vmem_residency_bytes(t_aligned, H, tn, logits_itemsize) <= cap:
        return t_aligned                   # single T tile (typical ADED decode path)
    for tm in (512, 256, 128, 64, 32, 16):
        if tm <= t_aligned and _vmem_residency_bytes(tm, H, tn, logits_itemsize) <= cap:
            return tm
    return 16


# ------------------------------------------------ fused RMSNorm + lm_head ---
def _fused_rmsnorm_lmhead_kernel(x_ref, g_ref, w_ref, h_ref, o_ref, *, eps):
    """grid = (T tiles, V tiles); V is innermost.

    x_ref : (tm, H)  bf16 pre-norm hidden
    g_ref : (1, H)   f32 RMSNorm gamma
    w_ref : (H, tn)  bf16 lm_head weight tile (pre-tiled, contiguous in HBM)
    h_ref : (tm, H)  bf16 normalized hidden OUT; resident across the V axis and
                     doubles as the matmul LHS (no extra scratch needed)
    o_ref : (tm, tn) logits tile OUT
    """
    # Compute the norm once per T tile; reuse it for every vocab tile.
    @pl.when(pl.program_id(1) == 0)
    def _():
        x = x_ref[...].astype(jnp.float32)
        ms = jnp.mean(x * x, axis=-1, keepdims=True)
        xn = x * jax.lax.rsqrt(ms + eps) * g_ref[...]
        h_ref[...] = xn.astype(h_ref.dtype)

    # (tm, H) @ (H, tn) on the MXU: bf16 inputs, f32 accumulate.
    o_ref[...] = jnp.dot(
        h_ref[...], w_ref[...], preferred_element_type=jnp.float32
    ).astype(o_ref.dtype)


def fused_rmsnorm_lm_head(x, gamma_2d, w_tiles, *, vocab_size, eps=1e-6,
                          logits_dtype=jnp.bfloat16, vmem_cap=None):
    """x: (T, H) bf16 pre-norm hidden; gamma_2d: (1, H) f32;
    w_tiles: (nV, H, tn) bf16 pre-tiled lm_head weight.

    Returns (normalized hidden (T, H) bf16, logits (T, vocab_size) logits_dtype).
    """
    T, H = x.shape
    nV, Hw, tn = w_tiles.shape
    assert Hw == H
    V_pad = nV * tn
    if vmem_cap is None:
        vmem_cap = _tpu_vmem_capacity_bytes()
    logits_itemsize = jnp.dtype(logits_dtype).itemsize

    tm = _pick_token_tile(T, H, tn, vmem_cap, logits_itemsize)
    T_pad = _round_up(T, tm)
    if T_pad != T:
        x = jnp.pad(x, ((0, T_pad - T), (0, 0)))  # padded rows are zeros, harmless

    grid = (T_pad // tm, nV)
    residency = _vmem_residency_bytes(tm, H, tn, logits_itemsize)
    vmem_limit = int(min(max(2 * residency, 32 * 1024 * 1024), 0.85 * vmem_cap))

    cost = pl.CostEstimate(
        flops=2 * T_pad * H * V_pad,
        transcendentals=T_pad,
        bytes_accessed=(grid[0] * H * V_pad * 2        # weight re-streamed per T tile
                        + 2 * T_pad * H * 2            # x in + h out (bf16)
                        + T_pad * V_pad * logits_itemsize),
    )

    kernel = functools.partial(_fused_rmsnorm_lmhead_kernel, eps=eps)
    out_shape = (
        jax.ShapeDtypeStruct((T_pad, H), jnp.bfloat16),
        jax.ShapeDtypeStruct((T_pad, V_pad), logits_dtype),
    )

    def _call(single_buffer_x):
        # x is constant across the inner V axis -> single-buffering it saves
        # VMEM that buys wider weight tiles (v7x headroom).
        x_kw = {"pipeline_mode": pl.Buffered(1)} if single_buffer_x else {}
        x_spec = pl.BlockSpec((tm, H), lambda i, j: (i, 0), **x_kw)
        g_spec = pl.BlockSpec((1, H), lambda i, j: (0, 0))
        w_spec = pl.BlockSpec((None, H, tn), lambda i, j: (j, 0, 0))   # contiguous tile DMA
        h_spec = pl.BlockSpec((tm, H), lambda i, j: (i, 0))
        o_spec = pl.BlockSpec((tm, tn), lambda i, j: (i, j))
        return pl.pallas_call(
            kernel,
            out_shape=out_shape,
            grid_spec=pltpu.PrefetchScalarGridSpec(
                num_scalar_prefetch=0,
                grid=grid,
                in_specs=[x_spec, g_spec, w_spec],
                out_specs=[h_spec, o_spec],
            ),
            compiler_params=pltpu.CompilerParams(
                # T tiles may shard across TensorCores; the V axis must stay
                # "arbitrary" (the normalized hidden is resident across it).
                dimension_semantics=("parallel", "arbitrary"),
                vmem_limit_bytes=vmem_limit,
            ),
            cost_estimate=cost,
        )(x, gamma_2d, w_tiles)

    try:
        h_out, logits = _call(True)
    except Exception:
        # Fallback if pipeline_mode=pl.Buffered(1) is unsupported by this jax/Mosaic.
        h_out, logits = _call(False)

    if T_pad != T:
        h_out, logits = h_out[:T], logits[:T]
    if V_pad != vocab_size:
        logits = logits[:, :vocab_size]
    return h_out, logits


# ----------------------------------------------------------- ADEDModel ------
class ADEDModelPallas:
    """Minimal JAX/Pallas re-implementation of ADEDModel.forward.

    The opaque `base_model.model` body is stood in by an embedding lookup; its
    final RMSNorm + the lm_head run as one fused Pallas kernel.
    """

    def __init__(self, embed, norm_gamma, lm_head_weight, *, eps=1e-6):
        V, H = lm_head_weight.shape          # PyTorch lm_head stores (vocab, hidden)
        assert embed.shape == (V, H) and norm_gamma.shape == (H,)
        self.hidden_size, self.vocab_size, self.eps = H, V, eps
        self.vmem_cap = _tpu_vmem_capacity_bytes()
        tn = _pick_vocab_tile(H, V, self.vmem_cap)
        V_pad = _round_up(V, tn)

        # One-time parameter prep (out of the per-call path):
        #   * embedding + lm_head weight cast to bf16 once,
        #   * vocab padded to a tile multiple once,
        #   * weight pre-tiled to (V_pad/tn, H, tn) so every kernel weight-tile
        #     DMA is a fully contiguous HBM block.
        self.embed = embed.astype(jnp.bfloat16)
        self.norm_gamma = norm_gamma.reshape(1, H).astype(jnp.float32)
        w_t = jnp.transpose(lm_head_weight).astype(jnp.bfloat16)      # (H, V)
        if V_pad != V:
            w_t = jnp.pad(w_t, ((0, 0), (0, V_pad - V)))
        self.w_tiles = jnp.transpose(w_t.reshape(H, V_pad // tn, tn), (1, 0, 2))
        self.tile_v = tn

    def forward(self, input_ids, output_orig=False):
        """input_ids: (B, S) int32 token ids.

        Returns ((hidden_states,), logits) when output_orig=True, matching the
        PyTorch `(outputs, orig)` return.
        """
        if not output_orig:
            raise NotImplementedError  # matches the PyTorch module
        B, S = input_ids.shape
        H, V = self.hidden_size, self.vocab_size
        # base_model.model stand-in (glue): bf16 embedding gather.
        # TODO(synk): decoder layers / KV cache of the opaque base_model and the
        #             aded_generate draft-tree decode are not reproduced here.
        h_pre = jnp.take(self.embed, input_ids.reshape(-1), axis=0)   # (B*S, H) bf16
        h, logits = fused_rmsnorm_lm_head(
            h_pre, self.norm_gamma, self.w_tiles,
            vocab_size=V, eps=self.eps, vmem_cap=self.vmem_cap)
        return (h.reshape(B, S, H),), logits.reshape(B, S, V)


if __name__ == "__main__":
    key = jax.random.PRNGKey(0)
    k_emb, k_norm, k_lm, k_ids = jax.random.split(key, 4)

    # Small shapes; vocab deliberately NOT a tile multiple (exercises init-time padding).
    batch, seq, hidden, vocab = 2, 8, 32, 2000
    embed = jax.random.normal(k_emb, (vocab, hidden), jnp.float32) * 0.02
    gamma = 1.0 + 0.01 * jax.random.normal(k_norm, (hidden,), jnp.float32)
    w_lm = jax.random.normal(k_lm, (vocab, hidden), jnp.float32) * 0.02

    model = ADEDModelPallas(embed, gamma, w_lm)
    input_ids = jax.random.randint(k_ids, (batch, seq), 0, vocab, dtype=jnp.int32)

    (hidden_states,), logits = model.forward(input_ids, output_orig=True)
    jax.block_until_ready((hidden_states, logits))

    # Plain-JAX reference (same bf16 parameter rounding as the kernel).
    x = jnp.take(embed.astype(jnp.bfloat16), input_ids.reshape(-1), axis=0).astype(jnp.float32)
    ms = jnp.mean(x * x, axis=-1, keepdims=True)
    h_ref = (x * jax.lax.rsqrt(ms + 1e-6) * gamma).astype(jnp.bfloat16)
    w_bf = w_lm.astype(jnp.bfloat16).astype(jnp.float32)
    logits_ref = jnp.dot(h_ref.astype(jnp.float32), w_bf.T)

    assert hidden_states.shape == (batch, seq, hidden)
    assert logits.shape == (batch, seq, vocab)
    assert jnp.allclose(
        hidden_states.astype(jnp.float32).reshape(-1, hidden),
        h_ref.astype(jnp.float32), atol=2e-2, rtol=2e-2), "hidden mismatch"
    assert jnp.allclose(
        logits.astype(jnp.float32).reshape(-1, vocab),
        logits_ref, atol=2e-2, rtol=2e-2), "logits mismatch"

    print("KERNEL_OK")
</pallas_src>

<mosaic_0001>
module attributes {stable_mosaic.version = 11 : i64} {
  func.func @_fused_rmsnorm_lmhead_kernel(%arg0: i32, %arg1: i32, %arg2: memref<16x32xbf16, #tpu.memory_space<vmem>>, %arg3: memref<1x32xf32, #tpu.memory_space<vmem>>, %arg4: memref<1x32x512xbf16, #tpu.memory_space<vmem>>, %arg5: memref<16x32xbf16, #tpu.memory_space<vmem>>, %arg6: memref<16x512xbf16, #tpu.memory_space<vmem>>) attributes {dimension_semantics = [#tpu.dimension_semantics<parallel>, #tpu.dimension_semantics<arbitrary>], iteration_bounds = array<i64: 1, 4>, scalar_prefetch = 0 : i64, scratch_operands = 0 : i64, tpu.core_type = #tpu.core_type<tc>, window_params = [{pipeline_mode = #tpu.pipeline_mode<synchronous>, transform_indices = @transform_0, window_bounds = array<i64: 16, 32>}, {pipeline_mode = #tpu.pipeline_mode<synchronous>, transform_indices = @transform_1, window_bounds = array<i64: 1, 32>}, {transform_indices = @transform_2, window_bounds = array<i64: 1, 32, 512>}, {transform_indices = @transform_3, window_bounds = array<i64: 16, 32>}, {transform_indices = @transform_4, window_bounds = array<i64: 16, 512>}]} {
    %c0_i32 = arith.constant 0 : i32
    %0 = arith.cmpi eq, %arg1, %c0_i32 : i32
    %1 = arith.extui %0 : i1 to i32
    %c0_i32_0 = arith.constant 0 : i32
    %2 = arith.cmpi ne, %1, %c0_i32_0 : i32
    scf.if %2 {
      %c0_7 = arith.constant 0 : index
      %c0_8 = arith.constant 0 : index
      %9 = vector.load %arg2[%c0_7, %c0_8] : memref<16x32xbf16, #tpu.memory_space<vmem>>, vector<16x32xbf16>
      %10 = arith.extf %9 : vector<16x32xbf16> to vector<16x32xf32>
      %11 = arith.mulf %10, %10 : vector<16x32xf32>
      %cst_9 = arith.constant dense<0.000000e+00> : vector<16xf32>
      %12 = vector.multi_reduction <add>, %11, %cst_9 [1] : vector<16x32xf32> to vector<16xf32>
      %13 = vector.shape_cast %12 : vector<16xf32> to vector<16x1xf32>
      %cst_10 = arith.constant 3.200000e+01 : f32
      %14 = vector.broadcast %cst_10 : f32 to vector<16x1xf32>
      %15 = arith.divf %13, %14 : vector<16x1xf32>
      %cst_11 = arith.constant 9.99999997E-7 : f32
      %16 = vector.broadcast %cst_11 : f32 to vector<16x1xf32>
      %17 = arith.addf %15, %16 : vector<16x1xf32>
      %18 = math.rsqrt %17 : vector<16x1xf32>
      %19 = vector.broadcast %18 : vector<16x1xf32> to vector<16x32xf32>
      %20 = arith.mulf %10, %19 : vector<16x32xf32>
      %c0_12 = arith.constant 0 : index
      %c0_13 = arith.constant 0 : index
      %21 = vector.load %arg3[%c0_12, %c0_13] : memref<1x32xf32, #tpu.memory_space<vmem>>, vector<1x32xf32>
      %22 = vector.broadcast %21 : vector<1x32xf32> to vector<16x32xf32>
      %23 = arith.mulf %20, %22 : vector<16x32xf32>
      %24 = arith.truncf %23 : vector<16x32xf32> to vector<16x32xbf16>
      %c0_14 = arith.constant 0 : index
      %c0_15 = arith.constant 0 : index
      %25 = vector.load %arg5[%c0_14, %c0_15] : memref<16x32xbf16, #tpu.memory_space<vmem>>, vector<16x32xbf16>
      tpu.vector_store %arg5[%c0_14, %c0_15], %24 {strides = array<i32>} : memref<16x32xbf16, #tpu.memory_space<vmem>>, vector<16x32xbf16>,
    } else {
    }
    %c0 = arith.constant 0 : index
    %c0_1 = arith.constant 0 : index
    %3 = vector.load %arg5[%c0, %c0_1] : memref<16x32xbf16, #tpu.memory_space<vmem>>, vector<16x32xbf16>
    %c0_2 = arith.constant 0 : index
    %c0_3 = arith.constant 0 : index
    %c0_4 = arith.constant 0 : index
    %4 = vector.load %arg4[%c0_2, %c0_3, %c0_4] : memref<1x32x512xbf16, #tpu.memory_space<vmem>>, vector<1x32x512xbf16>
    %5 = vector.shape_cast %4 : vector<1x32x512xbf16> to vector<32x512xbf16>
    %cst = arith.constant dense<0.000000e+00> : vector<16x512xf32>
    %6 = tpu.matmul %3, %5, %cst {dimension_numbers = #tpu.dot_dimension_numbers<[1], [0], [0], [1], [0, 0, 1, 1], [], []>} : vector<16x32xbf16>, vector<32x512xbf16>, vector<16x512xf32> -> vector<16x512xf32>
    %7 = arith.truncf %6 : vector<16x512xf32> to vector<16x512xbf16>
    %c0_5 = arith.constant 0 : index
    %c0_6 = arith.constant 0 : index
    %8 = vector.load %arg6[%c0_5, %c0_6] : memref<16x512xbf16, #tpu.memory_space<vmem>>, vector<16x512xbf16>
    tpu.vector_store %arg6[%c0_5, %c0_6], %7 {strides = array<i32>} : memref<16x512xbf16, #tpu.memory_space<vmem>>, vector<16x512xbf16>,
    return
  }
  func.func @transform_0(%arg0: i32, %arg1: i32) -> (i32, i32) {
    %c0_i32 = arith.constant 0 : i32
    %c0_i32_0 = arith.constant 0 : i32
    return %arg0, %c0_i32 : i32, i32
  }
  func.func @transform_1(%arg0: i32, %arg1: i32) -> (i32, i32) {
    %c0_i32 = arith.constant 0 : i32
    %c0_i32_0 = arith.constant 0 : i32
    %c0_i32_1 = arith.constant 0 : i32
    return %c0_i32, %c0_i32_0 : i32, i32
  }
  func.func @transform_2(%arg0: i32, %arg1: i32) -> (i32, i32, i32) {
    %c0_i32 = arith.constant 0 : i32
    %c0_i32_0 = arith.constant 0 : i32
    %c0_i32_1 = arith.constant 0 : i32
    return %arg1, %c0_i32, %c0_i32_0 : i32, i32, i32
  }
  func.func @transform_3(%arg0: i32, %arg1: i32) -> (i32, i32) {
    %c0_i32 = arith.constant 0 : i32
    %c0_i32_0 = arith.constant 0 : i32
    return %arg0, %c0_i32 : i32, i32
  }
  func.func @transform_4(%arg0: i32, %arg1: i32) -> (i32, i32) {
    %c0_i32 = arith.constant 0 : i32
    return %arg0, %arg1 : i32, i32
  }
}

module attributes {stable_mosaic.version = 11 : i64} {
  func.func @_fused_rmsnorm_lmhead_kernel(%arg0: i32, %arg1: i32, %arg2: memref<16x32xbf16, #tpu.memory_space<vmem>>, %arg3: memref<1x32xf32, #tpu.memory_space<vmem>>, %arg4: memref<1x32x512xbf16, #tpu.memory_space<vmem>>, %arg5: memref<16x32xbf16, #tpu.memory_space<vmem>>, %arg6: memref<16x512xbf16, #tpu.memory_space<vmem>>) attributes {dimension_semantics = [#tpu.dimension_semantics<parallel>, #tpu.dimension_semantics<arbitrary>], iteration_bounds = array<i64: 1, 4>, scalar_prefetch = 0 : i64, scratch_operands = 0 : i64, tpu.core_type = #tpu.core_type<tc>, window_params = [{transform_indices = @transform_0, window_bounds = array<i64: 16, 32>}, {pipeline_mode = #tpu.pipeline_mode<synchronous>, transform_indices = @transform_1, window_bounds = array<i64: 1, 32>}, {transform_indices = @transform_2, window_bounds = array<i64: 1, 32, 512>}, {transform_indices = @transform_3, window_bounds = array<i64: 16, 32>}, {transform_indices = @transform_4, window_bounds = array<i64: 16, 512>}]} {
    %c0_i32 = arith.constant 0 : i32
    %0 = arith.cmpi eq, %arg1, %c0_i32 : i32
    %1 = arith.extui %0 : i1 to i32
    %c0_i32_0 = arith.constant 0 : i32
    %2 = arith.cmpi ne, %1, %c0_i32_0 : i32
    scf.if %2 {
      %c0_7 = arith.constant 0 : index
      %c0_8 = arith.constant 0 : index
      %9 = vector.load %arg2[%c0_7, %c0_8] : memref<16x32xbf16, #tpu.memory_space<vmem>>, vector<16x32xbf16>
      %10 = arith.extf %9 : vector<16x32xbf16> to vector<16x32xf32>
      %11 = arith.mulf %10, %10 : vector<16x32xf32>
      %cst_9 = arith.constant dense<0.000000e+00> : vector<16xf32>
      %12 = vector.multi_reduction <add>, %11, %cst_9 [1] : vector<16x32xf32> to vector<16xf32>
      %13 = vector.shape_cast %12 : vector<16xf32> to vector<16x1xf32>
      %cst_10 = arith.constant 3.200000e+01 : f32
      %14 = vector.broadcast %cst_10 : f32 to vector<16x1xf32>
      %15 = arith.divf %13, %14 : vector<16x1xf32>
      %cst_11 = arith.constant 9.99999997E-7 : f32
      %16 = vector.broadcast %cst_11 : f32 to vector<16x1xf32>
      %17 = arith.addf %15, %16 : vector<16x1xf32>
      %18 = math.rsqrt %17 : vector<16x1xf32>
      %19 = vector.broadcast %18 : vector<16x1xf32> to vector<16x32xf32>
      %20 = arith.mulf %10, %19 : vector<16x32xf32>
      %c0_12 = arith.constant 0 : index
      %c0_13 = arith.constant 0 : index
      %21 = vector.load %arg3[%c0_12, %c0_13] : memref<1x32xf32, #tpu.memory_space<vmem>>, vector<1x32xf32>
      %22 = vector.broadcast %21 : vector<1x32xf32> to vector<16x32xf32>
      %23 = arith.mulf %20, %22 : vector<16x32xf32>
      %24 = arith.truncf %23 : vector<16x32xf32> to vector<16x32xbf16>
      %c0_14 = arith.constant 0 : index
      %c0_15 = arith.constant 0 : index
      %25 = vector.load %arg5[%c0_14, %c0_15] : memref<16x32xbf16, #tpu.memory_space<vmem>>, vector<16x32xbf16>
      tpu.vector_store %arg5[%c0_14, %c0_15], %24 {strides = array<i32>} : memref<16x32xbf16, #tpu.memory_space<vmem>>, vector<16x32xbf16>,
    } else {
    }
    %c0 = arith.constant 0 : index
    %c0_1 = arith.constant 0 : index
    %3 = vector.load %arg5[%c0, %c0_1] : memref<16x32xbf16, #tpu.memory_space<vmem>>, vector<16x32xbf16>
    %c0_2 = arith.constant 0 : index
    %c0_3 = arith.constant 0 : index
    %c0_4 = arith.constant 0 : index
    %4 = vector.load %arg4[%c0_2, %c0_3, %c0_4] : memref<1x32x512xbf16, #tpu.memory_space<vmem>>, vector<1x32x512xbf16>
    %5 = vector.shape_cast %4 : vector<1x32x512xbf16> to vector<32x512xbf16>
    %cst = arith.constant dense<0.000000e+00> : vector<16x512xf32>
    %6 = tpu.matmul %3, %5, %cst {dimension_numbers = #tpu.dot_dimension_numbers<[1], [0], [0], [1], [0, 0, 1, 1], [], []>} : vector<16x32xbf16>, vector<32x512xbf16>, vector<16x512xf32> -> vector<16x512xf32>
    %7 = arith.truncf %6 : vector<16x512xf32> to vector<16x512xbf16>
    %c0_5 = arith.constant 0 : index
    %c0_6 = arith.constant 0 : index
    %8 = vector.load %arg6[%c0_5, %c0_6] : memref<16x512xbf16, #tpu.memory_space<vmem>>, vector<16x512xbf16>
    tpu.vector_store %arg6[%c0_5, %c0_6], %7 {strides = array<i32>} : memref<16x512xbf16, #tpu.memory_space<vmem>>, vector<16x512xbf16>,
    return
  }
  func.func @transform_0(%arg0: i32, %arg1: i32) -> (i32, i32) {
    %c0_i32 = arith.constant 0 : i32
    %c0_i32_0 = arith.constant 0 : i32
    return %arg0, %c0_i32 : i32, i32
  }
  func.func @transform_1(%arg0: i32, %arg1: i32) -> (i32, i32) {
    %c0_i32 = arith.constant 0 : i32
    %c0_i32_0 = arith.constant 0 : i32
    %c0_i32_1 = arith.constant 0 : i32
    return %c0_i32, %c0_i32_0 : i32, i32
  }
  func.func @transform_2(%arg0: i32, %arg1: i32) -> (i32, i32, i32) {
    %c0_i32 = arith.constant 0 : i32
    %c0_i32_0 = arith.constant 0 : i32
    %c0_i32_1 = arith.constant 0 : i32
    return %arg1, %c0_i32, %c0_i32_0 : i32, i32, i32
  }
  func.func @transform_3(%arg0: i32, %arg1: i32) -> (i32, i32) {
    %c0_i32 = arith.constant 0 : i32
    %c0_i32_0 = arith.constant 0 : i32
    return %arg0, %c0_i32 : i32, i32
  }
  func.func @transform_4(%arg0: i32, %arg1: i32) -> (i32, i32) {
    %c0_i32 = arith.constant 0 : i32
    return %arg0, %arg1 : i32, i32
  }
}

</mosaic_0001>

<bundles_post_ra>
// kernel: tpu_custom_call.1
= control target key start
LH: loop header
LB: loop body
LE: loop exit
PB: predicated region body
PF: predicated region fallthrough
CT: control target
= control target key end

     0   :  { %s1244_s0 = inlined_call_operand.hbm [shape: bf16[16,32], index: 0, kind: input, shape index: {}]   ;;  %s1245_s1 = inlined_call_operand.hbm [shape: f32[1,32], index: 1, kind: input, shape index: {}]   ;;  %s1246_s2 = inlined_call_operand.hbm [shape: bf16[4,32,512], index: 2, kind: input, shape index: {}]   ;;  %s1247_s3 = inlined_call_operand.hbm [shape: bf16[16,32], index: 3, kind: output, shape index: {0}]   ;;  %s1248_s4 = inlined_call_operand.hbm [shape: bf16[16,2048], index: 4, kind: output, shape index: {1}]  }
   0x1   :  { %1249 = sst [smem:[#allocation16_spill]] %s1244_s0 }
   0x2   :  { %1250 = sst [smem:[#allocation17_spill]] %s1245_s1 }
   0x3   :  { %10 = vsyncpa [#allocation3], 0 }
   0x4   :  { %11 = vsyncpa [#allocation6], 0 }
   0x5   :  { %12 = vsyncpa [#allocation4], 0 }
   0x6   :  { %13 = vsyncpa [#allocation10], 0 }
   0x7   :  { %15 = vsyncpa [#allocation10 + $0x1], 0  ;;  %s1055_s15 = smov 0   ;;  %s1057_s16 = smov 0  }
   0x8   :  { %s1059_s17 = smov 0   ;;  %s1061_s18 = smov 0  }
   0x9   :  { %s1063_s19 = smov 0   ;;  %s1065_s20 = smov 0  }
   0xa LB: > { %s1086_s21 = sadd.s32 4294967295, %s1015_s20   ;;  %s620_s22 = sadd.s32 4294967294, %s1015_s20   ;;  %s1015_s20 = sphi %s1065_s20, %s21_s20   ;;  %s1011_s19 = sphi %s1063_s19, %s1262_s19   ;;  %s1007_s18 = sphi %s1061_s18, %s1261_s18   ;;  %s1003_s17 = sphi %s1059_s17, %s1260_s17   ;;  %s999_s16 = sphi %s1057_s16, %s1259_s16   ;;  %s995_s15 = sphi %s1055_s15, %s1258_s15  }
   0xb   : > { %p100_p0 = scmp.ne.s32.totalorder %s999_s16, %s995_s15  ;;  %p101_p1 = scmp.eq.s32.totalorder %s1086_s21, 0 }
   0xc   : > { %p152_p2 = scmp.eq.s32.totalorder %s1086_s21, 3  ;;  %p158_p3 = scmp.eq.s32.totalorder %s620_s22, 3 }
   0xd   : > { %p1095_p4 = por %p101_p1, %p100_p0  ;;  %p621_p5 = scmp.ge.s32.totalorder %s1015_s20, 1 }
   0xe   : > { %p1100_p6 = por %p158_p3, %p100_p0  ;;  %p165_p7 = scmp.lt.s32.totalorder %s1015_s20, 5 }
   0xf   : > { %s1253_s0 = sld [smem:[#allocation16_spill]]  ;;  %s1017_s29 = smov [#allocation2]  }
  0x10   : > { %p1108_p8 = pnand %p621_p5, %p165_p7  ;;  %s181_s30 = sshll.u32 %s1017_s29, 4  ;;  %s182_s30 = int_to_ptr.vmem [resolvable:$true] %s181_s30 }
  0x11   : > { %s1255_s1 = sld [smem:[#allocation17_spill]]  ;;  %s1018_s8 = smov 64  }
  0x12   : > { %p712_p9 = pneg %p1108_p8  ;;  %s1019_s9 = smov 4  }
  0x13   : > { %s1020_s10 = smov [#allocation5]   ;;  %s30_s12 = sadd.s32 1, %s1011_s19 }
  0x14   : > { %p713_p10 = pnand %p712_p9, %p101_p1  ;;  %s196_s11 = sshll.u32 %s1020_s10, 4  ;;  %s197_s11 = int_to_ptr.vmem [resolvable:$true] %s196_s11 }
  0x15   : > { %s179_s27 = sshll.u32 %s1253_s0, 4  ;;  %s87_s13 = sadd.s32 1, %s1003_s17  ;;  %s180_s27 = int_to_ptr.hbm [resolvable:$true] %s179_s27 }
  0x16   : > { %715 = dma.hbm_to_vmem [thread:$0]  (!%p713_p10), %s180_s27, 128, %s182_s30, [#allocation3], %s1018_s8, %s1018_s8, %s1019_s9  }
  0x17   : > { %s194_s7 = sshll.u32 %s1255_s1, 4  ;;  %p31_p11 = scmp.ge.s32.totalorder %s30_s12, 4  ;;  %s195_s7 = int_to_ptr.hbm [resolvable:$true] %s194_s7 }
  0x18   : > { %718 = dma.hbm_to_vmem [thread:$0]  (!%p713_p10), %s195_s7, 16, %s197_s11, [#allocation6]  }
  0x19   : > { %p94_p12 = scmp.ne.s32.totalorder %s1003_s17, %s999_s16  ;;  %p95_p13 = scmp.eq.s32.totalorder %s1015_s20, 0 }
  0x1a   : > { %p729_p0 = scmp.lt.s32.totalorder %s1015_s20, 4  ;;  %s1264_s12 = smov (%p31_p11, %s30_s12), 0 }
  0x1b   : > { %p1127_p3 = por %p95_p13, %p94_p12  ;;  %p1133_p5 = por %p152_p2, %p94_p12 }
  0x1c   : > { %s84_s25 = ssub.s32 %s1011_s19, %s1264_s12  ;;  %s207_s26 = sand.u32 1, %s1015_s20  }
  0x1d   : > { %p85_p7 = scmp.eq.s32.totalorder %s84_s25, 0  ;;  %s209_s27 = sand.u32 1, %s1003_s17  }
  0x1e   : > { %s681_s29 = sshll.u32 %s1011_s19, 6  ;;  %s625_s5 = sshll.u32 %s209_s27, 6 }
  0x1f   : > { %s1143_s30 = scalar_select %p85_p7, %s1003_s17, %s87_s13  }
  0x20   : > { %s216_s8 = scalar_lea.hbm %s1246_s2, %s681_s29  ;;  %s211_s10 = scalar_lea.vmem [#allocation7], %s625_s5 }
  0x21   : > { %s217_s9 = sshll.u32 %s216_s8, 4  ;;  %s219_s11 = sshll.u32 %s211_s10, 4  ;;  %s218_s9 = int_to_ptr.hbm [resolvable:$true] %s217_s9  ;;  %s220_s11 = int_to_ptr.vmem [resolvable:$true] %s219_s11 }
  0x22   : > { %p720_p9 = pnand %p729_p0, %p1127_p3  ;;  %s208_s0 = scalar_lea.sflag [#allocation3], %s207_s26 }
  0x23   : > { %s1021_s1 = smov 256   ;;  %s1022_s25 = smov 16  }
  0x24   : > { %722 = dma.hbm_to_vmem [thread:$0]  (!%p720_p9), %s218_s9, 1024, %s220_s11, %s208_s0, %s1021_s1, %s1021_s1, %s1022_s25  }
  0x25   : > { %231 = sbr.rel (%p1108_p8) target bundleno = 376 (0x178), region = 32 }
  0x2a   : > { %974 = dma.done.wait (%p101_p1), [#allocation3], 128  }
  0x2b   : > { %976 = vsyncadd (%p101_p1), [#allocation3], 4294967168 }
  0x2c   : > { %978 = dma.done.wait (%p101_p1), [#allocation6], 16  }
  0x2d   : > { %980 = vsyncadd (%p101_p1), [#allocation6], 4294967280  ;;  %s243_s13 = sand.u32 1, %s1086_s21   ;;  %s1164_s0 = sand.u32 1, %s999_s16  }
  0x2e   : > { %s631_s1 = sshll.u32 %s1164_s0, 6  ;;  %s244_s28 = scalar_lea.sflag [#allocation3], %s243_s13 }
  0x2f   : > { %s1167_s14 = scalar_lea.vmem [#allocation7], %s631_s1 }
  0x30   : > { %982 = dma.done.wait (%p1095_p4), %s244_s28, 1024  }
  0x31   : > { %984 = vsyncadd (%p1095_p4), %s244_s28, 4294966272  ;;  %s632_s26 = sshll.u32 %s1164_s0, 5  ;;  %p633_p1 = scmp.ne.s32.totalorder %s1007_s18, 0 }
  0x32   : > { %s1174_s27 = scalar_lea.vmem [#allocation9], %s632_s26 }
  0x33   : > { %281 = sbr.rel (%p633_p1) target bundleno = 215 (0xd7), region = 48 }
  0x38   : > { %v693_v0 = vld [vmem:[#allocation2] sm:$0xff]   ;;  %vm288_vm0 = vcmask 261120   ;;  %v1023_v7 = vmov 32.0   ;;  %v796_v28 = vld [vmem:[#allocation5] ss:$0 sm:$0xff]  ;;  %vm336_vm5 = vcmask 257024  }
  0x39   : > { %v694_v1 = vunpack.c.l.bf16 %v693_v0  ;;  %v695_v3 = vunpack.c.h.bf16 %v693_v0  ;;  %797 = vrcp.f32 %v1023_v7 }
  0x3b   : > { %v286_v2 = vmul.f32 %v694_v1, %v694_v1  ;;  %v287_v5 = vmul.f32 %v695_v3, %v695_v3 }
  0x3d   : > { %v289_v4 = vsel %vm288_vm0, %v286_v2, 0.0  ;;  %v292_v6 = vsel %vm288_vm0, %v287_v5, 0.0 }
  0x3e   : > { %290 = vadd.xlane.f32.xlu0 %v289_v4 }
  0x3f   : > { %v798_v8 = vpop.eup %797 }
  0x40   : > { %v296_v9 = vmul.f32 32.0, %v798_v8  ;;  %vm300_vm1 = vweird.f32 %v798_v8 }
  0x42   : > { %v297_v10 = vsub.f32 1.0, %v296_v9 }
  0x44   : > { %v298_v11 = vmul.f32 %v798_v8, %v297_v10 }
  0x46   : > { %293 = vadd.xlane.f32.xlu0 %v292_v6  ;;  %v299_v12 = vadd.f32 %v798_v8, %v298_v11 }
  0x48   : > { %v301_v13 = vsel %vm300_vm1, %v798_v8, %v299_v12 }
  0xb1   : > { %v291_v14 = vpop.xlane.xlu0 %290 }
  0xb2   : > { %v302_v15 = vmul.f32 %v301_v13, %v291_v14 }
  0xb4   : > { %v304_v16 = vadd.f32 1e-06, %v302_v15 }
  0xb6   : > { %799 = vrsqrt.f32 %v304_v16  ;;  %vm312_vm3 = vweird.f32 %v304_v16 }
  0xb9   : > { %v294_v17 = vpop.xlane.xlu0 %293 }
  0xba   : > { %v303_v18 = vmul.f32 %v301_v13, %v294_v17 }
  0xbc   : > { %v800_v19 = vpop.eup %799  ;;  %v305_v20 = vadd.f32 1e-06, %v303_v18 }
  0xbd   : > { %v307_v21 = vmul.f32 %v800_v19, %v304_v16  ;;  %vm313_vm2 = vweird.f32 %v800_v19 }
  0xbe   : > { %801 = vrsqrt.f32 %v305_v20  ;;  %vm314_vm4 = vmor %vm312_vm3, %vm313_vm2  ;;  %vm322_vm7 = vweird.f32 %v305_v20 }
  0xbf   : > { %v308_v22 = vmul.f32 %v800_v19, %v307_v21 }
  0xc1   : > { %v309_v23 = vmul.f32 0.5, %v308_v22 }
  0xc3   : > { %v310_v24 = vsub.f32 1.5, %v309_v23 }
  0xc4   : > { %v802_v25 = vpop.eup %801 }
  0xc5   : > { %v311_v26 = vmul.f32 %v800_v19, %v310_v24  ;;  %v317_v27 = vmul.f32 %v802_v25, %v305_v20  ;;  %vm323_vm6 = vweird.f32 %v802_v25 }
  0xc6   : > { %vm324_vm8 = vmor %vm322_vm7, %vm323_vm6 }
  0xc7   : > { %v315_v29 = vsel %vm314_vm4, %v800_v19, %v311_v26  ;;  %v318_v30 = vmul.f32 %v802_v25, %v317_v27 }
  0xc8   : > { %v326_v31 = vmul.f32 %v694_v1, %v315_v29 }
  0xc9   : > { %v319_v32 = vmul.f32 0.5, %v318_v30 }
  0xca   : > { %v332_v33 = vmul.f32 %v796_v28, %v326_v31 }
  0xcb   : > { %v320_v34 = vsub.f32 1.5, %v319_v32 }
  0xcc   : > { %v334_v35 = vpack.c.bf16 %v332_v33, %v332_v33 }
  0xcd   : > { %v321_v36 = vmul.f32 %v802_v25, %v320_v34 }
  0xce   : > { %337 = vst.msk [vmem:[#allocation8] sm:$0xf] %vm336_vm5, %v334_v35 }
  0xcf   : > { %v325_v37 = vsel %vm324_vm8, %v802_v25, %v321_v36 }
  0xd0   : > { %v327_v38 = vmul.f32 %v695_v3, %v325_v37 }
  0xd2   : > { %v333_v39 = vmul.f32 %v796_v28, %v327_v38 }
  0xd4   : > { %v335_v40 = vpack.c.bf16 %v333_v39, %v333_v39 }
  0xd6   : > { %338 = vst.msk [vmem:[#allocation8 + $0x4] sm:$0xf] %vm336_vm5, %v335_v40 }
  0xd7 PF: > { %v656_v41 = vld [vmem:[%s1167_s14 + $0x20] sm:$0xf]  ;;  %v689_v42 = vld [vmem:[%s1167_s14 + $0x2c] sm:$0xf0]  ;;  %v687_v43 = vld [vmem:[%s1167_s14 + $0x24] sm:$0xf] }
  0xd8   : > { %v657_v44 = vor.u32 %v689_v42, %v656_v41  ;;  %v658_v45 = vld [vmem:[%s1167_s14 + $0x30] sm:$0xf0]  ;;  %v664_v46 = vld [vmem:[%s1167_s14 + $0x28] sm:$0xf]  ;;  %v690_v47 = vld [vmem:[%s1167_s14 + $0x34] sm:$0xf0] }
  0xd9   : > { %v661_v48 = vor.u32 %v687_v43, %v658_v45  ;;  %v665_v49 = vor.u32 %v690_v47, %v664_v46  ;;  %v688_v50 = vld [vmem:[%s1167_s14 + $0x2c] sm:$0xf]  ;;  %v666_v51 = vld [vmem:[%s1167_s14 + $0x38] sm:$0xf0]  ;;  %v640_v52 = vld [vmem:[%s1167_s14] sm:$0xf] }
  0xda   : > { %404 = vmatpush.bf16.msra.mxu0 %v657_v44  ;;  %v669_v53 = vor.u32 %v688_v50, %v666_v51  ;;  %v685_v54 = vld [vmem:[%s1167_s14 + $0xc] sm:$0xf0]  ;;  %v683_v55 = vld [vmem:[%s1167_s14 + $0x4] sm:$0xf]  ;;  %v642_v56 = vld [vmem:[%s1167_s14 + $0x10] sm:$0xf0] }
  0xdb   : > { %418 = vmatpush.bf16.msra.mxu1 %v661_v48  ;;  %432 = vmatpush.bf16.msra.mxu2 %v665_v49  ;;  %v641_v57 = vor.u32 %v685_v54, %v640_v52  ;;  %v645_v58 = vor.u32 %v683_v55, %v642_v56  ;;  %v648_v59 = vld [vmem:[%s1167_s14 + $0x8] sm:$0xf]  ;;  %v686_v60 = vld [vmem:[%s1167_s14 + $0x14] sm:$0xf0]  ;;  %v684_v61 = vld [vmem:[%s1167_s14 + $0xc] sm:$0xf] }
  0xdc   : > { %446 = vmatpush.bf16.msra.mxu3 %v669_v53  ;;  %v649_v62 = vor.u32 %v686_v60, %v648_v59  ;;  %v650_v63 = vld [vmem:[%s1167_s14 + $0x18] sm:$0xf0]  ;;  %vm394_vm9 = vcmask 261120   ;;  %s1024_s23 = smov [#allocation8]   ;;  %s477_s7 = sshll.u32 %s1247_s3, 4  ;;  %s478_s7 = int_to_ptr.hbm [resolvable:$true] %s477_s7 }
  0xdd   : > { %v653_v0 = vor.u32 %v684_v61, %v650_v63  ;;  %v682_v1 = vld [vmem:[#allocation8] sm:$0xff]  ;;  %s475_s29 = sshll.u32 %s1024_s23, 4  ;;  %s1025_s8 = smov 64   ;;  %s476_s29 = int_to_ptr.vmem [resolvable:$true] %s475_s29 }
  0xde   : > { %405 = vmatpush.bf16.msra.mxu0 %v641_v57  ;;  %s1026_s9 = smov 4   ;;  %s691_s10 = sshll.u32 %s1007_s18, 4 }
  0xdf   : > { %419 = vmatpush.bf16.msra.mxu1 %v645_v58  ;;  %433 = vmatpush.bf16.msra.mxu2 %v649_v62  ;;  %707 = dma.vmem_to_hbm [thread:$0]  (%p152_p2), %s476_s29, 128, %s478_s7, [#allocation4], %s1025_s8, %s1025_s8, %s1026_s9  }
  0xe0   : > { %447 = vmatpush.bf16.msra.mxu3 %v653_v0  ;;  %s494_s13 = scalar_lea.hbm %s1248_s4, %s691_s10  ;;  %s495_s1 = sshll.u32 %s1174_s27, 4  ;;  %s496_s1 = int_to_ptr.vmem [resolvable:$true] %s495_s1 }
  0xe1   : > { %670 = vmatmul.msk.bf16.vlgmr.msra.gmra.mxu0 %vm394_vm9, %v682_v1  ;;  %s497_s28 = sshll.u32 %s494_s13, 4  ;;  %s463_s18 = scalar_lea.sflag [#allocation10], %s1164_s0  ;;  %s498_s28 = int_to_ptr.hbm [resolvable:$true] %s497_s28 }
  0xe2   : > { %671 = vmatmul.msk.bf16.vlgmr.msra.gmra.mxu1 %vm394_vm9, %v682_v1  ;;  %672 = vmatmul.msk.bf16.vlgmr.msra.gmra.mxu2 %vm394_vm9, %v682_v1  ;;  %s935_s14 = sshra.s32 %s498_s28, 4  ;;  %s941_s5 = scalar_lea.hbm %s1248_s4, 128  ;;  %s936_s14 = int_to_ptr.hbm [resolvable:$true] %s935_s14 }
  0xe3   : > { %673 = vmatmul.msk.bf16.vlgmr.msra.gmra.mxu3 %vm394_vm9, %v682_v1  ;;  %s937_s26 = scalar_lea.hbm %s936_s14, 32  ;;  %p942_p11 = scmp.lt.s32.totalorder %s936_s14, %s1248_s4 }
  0xe4   : > { %p938_p4 = scmp.ne.s32.totalorder %s936_s14, %s937_s26  ;;  %p943_p12 = scmp.lt.s32.totalorder %s941_s5, %s937_s26 }
  0xe6   : > { %p939_p8 = pnand %p938_p4, %p1133_p5  ;;  %p944_p13 = por %p943_p12, %p942_p11 }
  0xe8   : > { %p940_p10 = pneg %p939_p8 }
  0xea   : > { %p945_p0 = pnand %p944_p13, %p940_p10 }
 0x15e   : > { %v407_v2 = vpop.f32.mrf.mxu0 }
 0x15f   : > { %v421_v3 = vpop.f32.mrf.mxu1 }
 0x160   : > { %v454_v4 = vpack.c.bf16 %v421_v3, %v407_v2 }
 0x162   : > { %458 = vst [vmem:[%s1174_s27] sm:$0xff] %v454_v4 }
 0x165   : > { %v435_v5 = vpop.f32.mrf.mxu2 }
 0x166   : > { %v449_v6 = vpop.f32.mrf.mxu3  ;;  %v409_v7 = vpop.f32.mrf.mxu0 }
 0x167   : > { %v455_v8 = vpack.c.bf16 %v449_v6, %v435_v5  ;;  %v423_v9 = vpop.f32.mrf.mxu1 }
 0x168   : > { %v456_v10 = vpack.c.bf16 %v423_v9, %v409_v7 }
 0x169   : > { %459 = vst [vmem:[%s1174_s27 + $0x8] sm:$0xff] %v455_v8 }
 0x16a   : > { %460 = vst [vmem:[%s1174_s27 + $0x10] sm:$0xff] %v456_v10 }
 0x16d   : > { %v437_v11 = vpop.f32.mrf.mxu2 }
 0x16e   : > { %v451_v12 = vpop.f32.mrf.mxu3 }
 0x16f   : > { %v457_v13 = vpack.c.bf16 %v451_v12, %v437_v11 }
 0x171   : > { %461 = vst [vmem:[%s1174_s27 + $0x18] sm:$0xff] %v457_v13 }
 0x172   : > { %948 = shalt.err (!%p945_p0)
}
 0x173   : > { %s1027_s0 = smov 256   ;;  %s1028_s27 = smov 1024  }
 0x174   : > { %s1029_s8 = smov 16  }
 0x175   : > { %708 = dma.vmem_to_hbm [thread:$0]  (%p1133_p5), %s496_s1, 512, %s498_s28, %s463_s18, %s1027_s0, %s1028_s27, %s1029_s8  }
 0x176   : > { %986 = dma.done.wait (%p152_p2), [#allocation4], 128  }
 0x177   : > { %988 = vsyncadd (%p152_p2), [#allocation4], 4294967168 }
 0x178 PF: > { %p734_p3 = scmp.ge.s32.totalorder %s1015_s20, 2  ;;  %s517_s9 = sand.u32 1, %s995_s15  }
 0x179   : > { %s518_s10 = scalar_lea.sflag [#allocation10], %s517_s9 }
 0x17a   : > { %p724_p7 = pnand %p734_p3, %p1100_p6 }
 0x17c   : > { %p725_p9 = pneg %p724_p7 }
 0x17e   : > { %990 = dma.done.wait (%p725_p9), %s518_s10, 512  }
 0x17f   : > { %992 = vsyncadd (%p725_p9), %s518_s10, 4294966784  ;;  %s21_s20 = sadd.s32 1, %s1015_s20   ;;  %s1258_s15 = smov %s999_s16 }
 0x180   : > { %p18_p5 = scmp.ge.s32.totalorder %s21_s20, 6   ;;  %s1259_s16 = smov %s1003_s17 }
 0x181   : > { %s1260_s17 = smov %s1143_s30  ;;  %s1261_s18 = smov %s1011_s19 }
 0x182   : > { %s1262_s19 = smov %s1264_s12  ;;  %20 = sbr.rel (!%p18_p5) target bundleno = 10 (0xa), region = 99 }
 0x187   :  { %524 = vsyncpa [#allocation3], 1 }
 0x188   :  { %526 = vsyncpa [#allocation3 + $0x1], 1 }
 0x189   :  { %527 = vsyncpa [#allocation6], 1 }
 0x18a   :  { %528 = vsyncpa [#allocation4], 1 }
 0x18b   :  { %530 = vsyncpa [#allocation4 + $0x1], 1 }
 0x18c   :  { %531 = vsyncpa [#allocation10], 1 }
 0x18d   :  { %533 = vsyncpa [#allocation10 + $0x1], 1 }

// kernel: tpu_custom_call.1
= control target key start
LH: loop header
LB: loop body
LE: loop exit
PB: predicated region body
PF: predicated region fallthrough
CT: control target
= control target key end

     0   :  { %s1244_s0 = inlined_call_operand.hbm [shape: bf16[16,32], index: 0, kind: input, shape index: {}]   ;;  %s1245_s1 = inlined_call_operand.hbm [shape: f32[1,32], index: 1, kind: input, shape index: {}]   ;;  %s1246_s2 = inlined_call_operand.hbm [shape: bf16[4,32,512], index: 2, kind: input, shape index: {}]   ;;  %s1247_s3 = inlined_call_operand.hbm [shape: bf16[16,32], index: 3, kind: output, shape index: {0}]   ;;  %s1248_s4 = inlined_call_operand.hbm [shape: bf16[16,2048], index: 4, kind: output, shape index: {1}]  }
   0x1   :  { %1249 = sst [smem:[#allocation16_spill]] %s1244_s0 }
   0x2   :  { %1250 = sst [smem:[#allocation17_spill]] %s1245_s1 }
   0x3   :  { %10 = vsyncpa [#allocation3], 0 }
   0x4   :  { %11 = vsyncpa [#allocation6], 0 }
   0x5   :  { %12 = vsyncpa [#allocation4], 0 }
   0x6   :  { %13 = vsyncpa [#allocation10], 0 }
   0x7   :  { %15 = vsyncpa [#allocation10 + $0x1], 0  ;;  %s1055_s15 = smov 0   ;;  %s1057_s16 = smov 0  }
   0x8   :  { %s1059_s17 = smov 0   ;;  %s1061_s18 = smov 0  }
   0x9   :  { %s1063_s19 = smov 0   ;;  %s1065_s20 = smov 0  }
   0xa LB: > { %s1086_s21 = sadd.s32 4294967295, %s1015_s20   ;;  %s620_s22 = sadd.s32 4294967294, %s1015_s20   ;;  %s1015_s20 = sphi %s1065_s20, %s21_s20   ;;  %s1011_s19 = sphi %s1063_s19, %s1262_s19   ;;  %s1007_s18 = sphi %s1061_s18, %s1261_s18   ;;  %s1003_s17 = sphi %s1059_s17, %s1260_s17   ;;  %s999_s16 = sphi %s1057_s16, %s1259_s16   ;;  %s995_s15 = sphi %s1055_s15, %s1258_s15  }
   0xb   : > { %p100_p0 = scmp.ne.s32.totalorder %s999_s16, %s995_s15  ;;  %p101_p1 = scmp.eq.s32.totalorder %s1086_s21, 0 }
   0xc   : > { %p152_p2 = scmp.eq.s32.totalorder %s1086_s21, 3  ;;  %p158_p3 = scmp.eq.s32.totalorder %s620_s22, 3 }
   0xd   : > { %p1095_p4 = por %p101_p1, %p100_p0  ;;  %p621_p5 = scmp.ge.s32.totalorder %s1015_s20, 1 }
   0xe   : > { %p1100_p6 = por %p158_p3, %p100_p0  ;;  %p165_p7 = scmp.lt.s32.totalorder %s1015_s20, 5 }
   0xf   : > { %s1253_s0 = sld [smem:[#allocation16_spill]]  ;;  %s1017_s29 = smov [#allocation2]  }
  0x10   : > { %p1108_p8 = pnand %p621_p5, %p165_p7  ;;  %s181_s30 = sshll.u32 %s1017_s29, 4  ;;  %s182_s30 = int_to_ptr.vmem [resolvable:$true] %s181_s30 }
  0x11   : > { %s1255_s1 = sld [smem:[#allocation17_spill]]  ;;  %s1018_s8 = smov 64  }
  0x12   : > { %p712_p9 = pneg %p1108_p8  ;;  %s1019_s9 = smov 4  }
  0x13   : > { %s1020_s10 = smov [#allocation5]   ;;  %s30_s12 = sadd.s32 1, %s1011_s19 }
  0x14   : > { %p713_p10 = pnand %p712_p9, %p101_p1  ;;  %s196_s11 = sshll.u32 %s1020_s10, 4  ;;  %s197_s11 = int_to_ptr.vmem [resolvable:$true] %s196_s11 }
  0x15   : > { %s179_s27 = sshll.u32 %s1253_s0, 4  ;;  %s87_s13 = sadd.s32 1, %s1003_s17  ;;  %s180_s27 = int_to_ptr.hbm [resolvable:$true] %s179_s27 }
  0x16   : > { %715 = dma.hbm_to_vmem [thread:$0]  (!%p713_p10), %s180_s27, 128, %s182_s30, [#allocation3], %s1018_s8, %s1018_s8, %s1019_s9  }
  0x17   : > { %s194_s7 = sshll.u32 %s1255_s1, 4  ;;  %p31_p11 = scmp.ge.s32.totalorder %s30_s12, 4  ;;  %s195_s7 = int_to_ptr.hbm [resolvable:$true] %s194_s7 }
  0x18   : > { %718 = dma.hbm_to_vmem [thread:$0]  (!%p713_p10), %s195_s7, 16, %s197_s11, [#allocation6]  }
  0x19   : > { %p94_p12 = scmp.ne.s32.totalorder %s1003_s17, %s999_s16  ;;  %p95_p13 = scmp.eq.s32.totalorder %s1015_s20, 0 }
  0x1a   : > { %p729_p0 = scmp.lt.s32.totalorder %s1015_s20, 4  ;;  %s1264_s12 = smov (%p31_p11, %s30_s12), 0 }
  0x1b   : > { %p1127_p3 = por %p95_p13, %p94_p12  ;;  %p1133_p5 = por %p152_p2, %p94_p12 }
  0x1c   : > { %s84_s25 = ssub.s32 %s1011_s19, %s1264_s12  ;;  %s207_s26 = sand.u32 1, %s1015_s20  }
  0x1d   : > { %p85_p7 = scmp.eq.s32.totalorder %s84_s25, 0  ;;  %s209_s27 = sand.u32 1, %s1003_s17  }
  0x1e   : > { %s681_s29 = sshll.u32 %s1011_s19, 6  ;;  %s625_s5 = sshll.u32 %s209_s27, 6 }
  0x1f   : > { %s1143_s30 = scalar_select %p85_p7, %s1003_s17, %s87_s13  }
  0x20   : > { %s216_s8 = scalar_lea.hbm %s1246_s2, %s681_s29  ;;  %s211_s10 = scalar_lea.vmem [#allocation7], %s625_s5 }
  0x21   : > { %s217_s9 = sshll.u32 %s216_s8, 4  ;;  %s219_s11 = sshll.u32 %s211_s10, 4  ;;  %s218_s9 = int_to_ptr.hbm [resolvable:$true] %s217_s9  ;;  %s220_s11 = int_to_ptr.vmem [resolvable:$true] %s219_s11 }
  0x22   : > { %p720_p9 = pnand %p729_p0, %p1127_p3  ;;  %s208_s0 = scalar_lea.sflag [#allocation3], %s207_s26 }
  0x23   : > { %s1021_s1 = smov 256   ;;  %s1022_s25 = smov 16  }
  0x24   : > { %722 = dma.hbm_to_vmem [thread:$0]  (!%p720_p9), %s218_s9, 1024, %s220_s11, %s208_s0, %s1021_s1, %s1021_s1, %s1022_s25  }
  0x25   : > { %231 = sbr.rel (%p1108_p8) target bundleno = 376 (0x178), region = 32 }
  0x2a   : > { %974 = dma.done.wait (%p101_p1), [#allocation3], 128  }
  0x2b   : > { %976 = vsyncadd (%p101_p1), [#allocation3], 4294967168 }
  0x2c   : > { %978 = dma.done.wait (%p101_p1), [#allocation6], 16  }
  0x2d   : > { %980 = vsyncadd (%p101_p1), [#allocation6], 4294967280  ;;  %s243_s13 = sand.u32 1, %s1086_s21   ;;  %s1164_s0 = sand.u32 1, %s999_s16  }
  0x2e   : > { %s631_s1 = sshll.u32 %s1164_s0, 6  ;;  %s244_s28 = scalar_lea.sflag [#allocation3], %s243_s13 }
  0x2f   : > { %s1167_s14 = scalar_lea.vmem [#allocation7], %s631_s1 }
  0x30   : > { %982 = dma.done.wait (%p1095_p4), %s244_s28, 1024  }
  0x31   : > { %984 = vsyncadd (%p1095_p4), %s244_s28, 4294966272  ;;  %s632_s26 = sshll.u32 %s1164_s0, 5  ;;  %p633_p1 = scmp.ne.s32.totalorder %s1007_s18, 0 }
  0x32   : > { %s1174_s27 = scalar_lea.vmem [#allocation9], %s632_s26 }
  0x33   : > { %281 = sbr.rel (%p633_p1) target bundleno = 215 (0xd7), region = 48 }
  0x38   : > { %v693_v0 = vld [vmem:[#allocation2] sm:$0xff]   ;;  %vm288_vm0 = vcmask 261120   ;;  %v1023_v7 = vmov 32.0   ;;  %v796_v28 = vld [vmem:[#allocation5] ss:$0 sm:$0xff]  ;;  %vm336_vm5 = vcmask 257024  }
  0x39   : > { %v694_v1 = vunpack.c.l.bf16 %v693_v0  ;;  %v695_v3 = vunpack.c.h.bf16 %v693_v0  ;;  %797 = vrcp.f32 %v1023_v7 }
  0x3b   : > { %v286_v2 = vmul.f32 %v694_v1, %v694_v1  ;;  %v287_v5 = vmul.f32 %v695_v3, %v695_v3 }
  0x3d   : > { %v289_v4 = vsel %vm288_vm0, %v286_v2, 0.0  ;;  %v292_v6 = vsel %vm288_vm0, %v287_v5, 0.0 }
  0x3e   : > { %290 = vadd.xlane.f32.xlu0 %v289_v4 }
  0x3f   : > { %v798_v8 = vpop.eup %797 }
  0x40   : > { %v296_v9 = vmul.f32 32.0, %v798_v8  ;;  %vm300_vm1 = vweird.f32 %v798_v8 }
  0x42   : > { %v297_v10 = vsub.f32 1.0, %v296_v9 }
  0x44   : > { %v298_v11 = vmul.f32 %v798_v8, %v297_v10 }
  0x46   : > { %293 = vadd.xlane.f32.xlu0 %v292_v6  ;;  %v299_v12 = vadd.f32 %v798_v8, %v298_v11 }
  0x48   : > { %v301_v13 = vsel %vm300_vm1, %v798_v8, %v299_v12 }
  0xb1   : > { %v291_v14 = vpop.xlane.xlu0 %290 }
  0xb2   : > { %v302_v15 = vmul.f32 %v301_v13, %v291_v14 }
  0xb4   : > { %v304_v16 = vadd.f32 1e-06, %v302_v15 }
  0xb6   : > { %799 = vrsqrt.f32 %v304_v16  ;;  %vm312_vm3 = vweird.f32 %v304_v16 }
  0xb9   : > { %v294_v17 = vpop.xlane.xlu0 %293 }
  0xba   : > { %v303_v18 = vmul.f32 %v301_v13, %v294_v17 }
  0xbc   : > { %v800_v19 = vpop.eup %799  ;;  %v305_v20 = vadd.f32 1e-06, %v303_v18 }
  0xbd   : > { %v307_v21 = vmul.f32 %v800_v19, %v304_v16  ;;  %vm313_vm2 = vweird.f32 %v800_v19 }
  0xbe   : > { %801 = vrsqrt.f32 %v305_v20  ;;  %vm314_vm4 = vmor %vm312_vm3, %vm313_vm2  ;;  %vm322_vm7 = vweird.f32 %v305_v20 }
  0xbf   : > { %v308_v22 = vmul.f32 %v800_v19, %v307_v21 }
  0xc1   : > { %v309_v23 = vmul.f32 0.5, %v308_v22 }
  0xc3   : > { %v310_v24 = vsub.f32 1.5, %v309_v23 }
  0xc4   : > { %v802_v25 = vpop.eup %801 }
  0xc5   : > { %v311_v26 = vmul.f32 %v800_v19, %v310_v24  ;;  %v317_v27 = vmul.f32 %v802_v25, %v305_v20  ;;  %vm323_vm6 = vweird.f32 %v802_v25 }
  0xc6   : > { %vm324_vm8 = vmor %vm322_vm7, %vm323_vm6 }
  0xc7   : > { %v315_v29 = vsel %vm314_vm4, %v800_v19, %v311_v26  ;;  %v318_v30 = vmul.f32 %v802_v25, %v317_v27 }
  0xc8   : > { %v326_v31 = vmul.f32 %v694_v1, %v315_v29 }
  0xc9   : > { %v319_v32 = vmul.f32 0.5, %v318_v30 }
  0xca   : > { %v332_v33 = vmul.f32 %v796_v28, %v326_v31 }
  0xcb   : > { %v320_v34 = vsub.f32 1.5, %v319_v32 }
  0xcc   : > { %v334_v35 = vpack.c.bf16 %v332_v33, %v332_v33 }
  0xcd   : > { %v321_v36 = vmul.f32 %v802_v25, %v320_v34 }
  0xce   : > { %337 = vst.msk [vmem:[#allocation8] sm:$0xf] %vm336_vm5, %v334_v35 }
  0xcf   : > { %v325_v37 = vsel %vm324_vm8, %v802_v25, %v321_v36 }
  0xd0   : > { %v327_v38 = vmul.f32 %v695_v3, %v325_v37 }
  0xd2   : > { %v333_v39 = vmul.f32 %v796_v28, %v327_v38 }
  0xd4   : > { %v335_v40 = vpack.c.bf16 %v333_v39, %v333_v39 }
  0xd6   : > { %338 = vst.msk [vmem:[#allocation8 + $0x4] sm:$0xf] %vm336_vm5, %v335_v40 }
  0xd7 PF: > { %v656_v41 = vld [vmem:[%s1167_s14 + $0x20] sm:$0xf]  ;;  %v689_v42 = vld [vmem:[%s1167_s14 + $0x2c] sm:$0xf0]  ;;  %v687_v43 = vld [vmem:[%s1167_s14 + $0x24] sm:$0xf] }
  0xd8   : > { %v657_v44 = vor.u32 %v689_v42, %v656_v41  ;;  %v658_v45 = vld [vmem:[%s1167_s14 + $0x30] sm:$0xf0]  ;;  %v664_v46 = vld [vmem:[%s1167_s14 + $0x28] sm:$0xf]  ;;  %v690_v47 = vld [vmem:[%s1167_s14 + $0x34] sm:$0xf0] }
  0xd9   : > { %v661_v48 = vor.u32 %v687_v43, %v658_v45  ;;  %v665_v49 = vor.u32 %v690_v47, %v664_v46  ;;  %v688_v50 = vld [vmem:[%s1167_s14 + $0x2c] sm:$0xf]  ;;  %v666_v51 = vld [vmem:[%s1167_s14 + $0x38] sm:$0xf0]  ;;  %v640_v52 = vld [vmem:[%s1167_s14] sm:$0xf] }
  0xda   : > { %404 = vmatpush.bf16.msra.mxu0 %v657_v44  ;;  %v669_v53 = vor.u32 %v688_v50, %v666_v51  ;;  %v685_v54 = vld [vmem:[%s1167_s14 + $0xc] sm:$0xf0]  ;;  %v683_v55 = vld [vmem:[%s1167_s14 + $0x4] sm:$0xf]  ;;  %v642_v56 = vld [vmem:[%s1167_s14 + $0x10] sm:$0xf0] }
  0xdb   : > { %418 = vmatpush.bf16.msra.mxu1 %v661_v48  ;;  %432 = vmatpush.bf16.msra.mxu2 %v665_v49  ;;  %v641_v57 = vor.u32 %v685_v54, %v640_v52  ;;  %v645_v58 = vor.u32 %v683_v55, %v642_v56  ;;  %v648_v59 = vld [vmem:[%s1167_s14 + $0x8] sm:$0xf]  ;;  %v686_v60 = vld [vmem:[%s1167_s14 + $0x14] sm:$0xf0]  ;;  %v684_v61 = vld [vmem:[%s1167_s14 + $0xc] sm:$0xf] }
  0xdc   : > { %446 = vmatpush.bf16.msra.mxu3 %v669_v53  ;;  %v649_v62 = vor.u32 %v686_v60, %v648_v59  ;;  %v650_v63 = vld [vmem:[%s1167_s14 + $0x18] sm:$0xf0]  ;;  %vm394_vm9 = vcmask 261120   ;;  %s1024_s23 = smov [#allocation8]   ;;  %s477_s7 = sshll.u32 %s1247_s3, 4  ;;  %s478_s7 = int_to_ptr.hbm [resolvable:$true] %s477_s7 }
  0xdd   : > { %v653_v0 = vor.u32 %v684_v61, %v650_v63  ;;  %v682_v1 = vld [vmem:[#allocation8] sm:$0xff]  ;;  %s475_s29 = sshll.u32 %s1024_s23, 4  ;;  %s1025_s8 = smov 64   ;;  %s476_s29 = int_to_ptr.vmem [resolvable:$true] %s475_s29 }
  0xde   : > { %405 = vmatpush.bf16.msra.mxu0 %v641_v57  ;;  %s1026_s9 = smov 4   ;;  %s691_s10 = sshll.u32 %s1007_s18, 4 }
  0xdf   : > { %419 = vmatpush.bf16.msra.mxu1 %v645_v58  ;;  %433 = vmatpush.bf16.msra.mxu2 %v649_v62  ;;  %707 = dma.vmem_to_hbm [thread:$0]  (%p152_p2), %s476_s29, 128, %s478_s7, [#allocation4], %s1025_s8, %s1025_s8, %s1026_s9  }
  0xe0   : > { %447 = vmatpush.bf16.msra.mxu3 %v653_v0  ;;  %s494_s13 = scalar_lea.hbm %s1248_s4, %s691_s10  ;;  %s495_s1 = sshll.u32 %s1174_s27, 4  ;;  %s496_s1 = int_to_ptr.vmem [resolvable:$true] %s495_s1 }
  0xe1   : > { %670 = vmatmul.msk.bf16.vlgmr.msra.gmra.mxu0 %vm394_vm9, %v682_v1  ;;  %s497_s28 = sshll.u32 %s494_s13, 4  ;;  %s463_s18 = scalar_lea.sflag [#allocation10], %s1164_s0  ;;  %s498_s28 = int_to_ptr.hbm [resolvable:$true] %s497_s28 }
  0xe2   : > { %671 = vmatmul.msk.bf16.vlgmr.msra.gmra.mxu1 %vm394_vm9, %v682_v1  ;;  %672 = vmatmul.msk.bf16.vlgmr.msra.gmra.mxu2 %vm394_vm9, %v682_v1  ;;  %s935_s14 = sshra.s32 %s498_s28, 4  ;;  %s941_s5 = scalar_lea.hbm %s1248_s4, 128  ;;  %s936_s14 = int_to_ptr.hbm [resolvable:$true] %s935_s14 }
  0xe3   : > { %673 = vmatmul.msk.bf16.vlgmr.msra.gmra.mxu3 %vm394_vm9, %v682_v1  ;;  %s937_s26 = scalar_lea.hbm %s936_s14, 32  ;;  %p942_p11 = scmp.lt.s32.totalorder %s936_s14, %s1248_s4 }
  0xe4   : > { %p938_p4 = scmp.ne.s32.totalorder %s936_s14, %s937_s26  ;;  %p943_p12 = scmp.lt.s32.totalorder %s941_s5, %s937_s26 }
  0xe6   : > { %p939_p8 = pnand %p938_p4, %p1133_p5  ;;  %p944_p13 = por %p943_p12, %p942_p11 }
  0xe8   : > { %p940_p10 = pneg %p939_p8 }
  0xea   : > { %p945_p0 = pnand %p944_p13, %p940_p10 }
 0x15e   : > { %v407_v2 = vpop.f32.mrf.mxu0 }
 0x15f   : > { %v421_v3 = vpop.f32.mrf.mxu1 }
 0x160   : > { %v454_v4 = vpack.c.bf16 %v421_v3, %v407_v2 }
 0x162   : > { %458 = vst [vmem:[%s1174_s27] sm:$0xff] %v454_v4 }
 0x165   : > { %v435_v5 = vpop.f32.mrf.mxu2 }
 0x166   : > { %v449_v6 = vpop.f32.mrf.mxu3  ;;  %v409_v7 = vpop.f32.mrf.mxu0 }
 0x167   : > { %v455_v8 = vpack.c.bf16 %v449_v6, %v435_v5  ;;  %v423_v9 = vpop.f32.mrf.mxu1 }
 0x168   : > { %v456_v10 = vpack.c.bf16 %v423_v9, %v409_v7 }
 0x169   : > { %459 = vst [vmem:[%s1174_s27 + $0x8] sm:$0xff] %v455_v8 }
 0x16a   : > { %460 = vst [vmem:[%s1174_s27 + $0x10] sm:$0xff] %v456_v10 }
 0x16d   : > { %v437_v11 = vpop.f32.mrf.mxu2 }
 0x16e   : > { %v451_v12 = vpop.f32.mrf.mxu3 }
 0x16f   : > { %v457_v13 = vpack.c.bf16 %v451_v12, %v437_v11 }
 0x171   : > { %461 = vst [vmem:[%s1174_s27 + $0x18] sm:$0xff] %v457_v13 }
 0x172   : > { %948 = shalt.err (!%p945_p0)
}
 0x173   : > { %s1027_s0 = smov 256   ;;  %s1028_s27 = smov 1024  }
 0x174   : > { %s1029_s8 = smov 16  }
 0x175   : > { %708 = dma.vmem_to_hbm [thread:$0]  (%p1133_p5), %s496_s1, 512, %s498_s28, %s463_s18, %s1027_s0, %s1028_s27, %s1029_s8  }
 0x176   : > { %986 = dma.done.wait (%p152_p2), [#allocation4], 128  }
 0x177   : > { %988 = vsyncadd (%p152_p2), [#allocation4], 4294967168 }
 0x178 PF: > { %p734_p3 = scmp.ge.s32.totalorder %s1015_s20, 2  ;;  %s517_s9 = sand.u32 1, %s995_s15  }
 0x179   : > { %s518_s10 = scalar_lea.sflag [#allocation10], %s517_s9 }
 0x17a   : > { %p724_p7 = pnand %p734_p3, %p1100_p6 }
 0x17c   : > { %p725_p9 = pneg %p724_p7 }
 0x17e   : > { %990 = dma.done.wait (%p725_p9), %s518_s10, 512  }
 0x17f   : > { %992 = vsyncadd (%p725_p9), %s518_s10, 4294966784  ;;  %s21_s20 = sadd.s32 1, %s1015_s20   ;;  %s1258_s15 = smov %s999_s16 }
 0x180   : > { %p18_p5 = scmp.ge.s32.totalorder %s21_s20, 6   ;;  %s1259_s16 = smov %s1003_s17 }
 0x181   : > { %s1260_s17 = smov %s1143_s30  ;;  %s1261_s18 = smov %s1011_s19 }
 0x182   : > { %s1262_s19 = smov %s1264_s12  ;;  %20 = sbr.rel (!%p18_p5) target bundleno = 10 (0xa), region = 99 }
 0x187   :  { %524 = vsyncpa [#allocation3], 1 }
 0x188   :  { %526 = vsyncpa [#allocation3 + $0x1], 1 }
 0x189   :  { %527 = vsyncpa [#allocation6], 1 }
 0x18a   :  { %528 = vsyncpa [#allocation4], 1 }
 0x18b   :  { %530 = vsyncpa [#allocation4 + $0x1], 1 }
 0x18c   :  { %531 = vsyncpa [#allocation10], 1 }
 0x18d   :  { %533 = vsyncpa [#allocation10 + $0x1], 1 }

</bundles_post_ra>
